<compile_context>
chip_gen: v7x
topology: tpu7x:2x2x1
jax: 0.10.0
libtpu: 0.0.40
codegen_flags: <defaults>
</compile_context>

<pallas_src>
import math

import jax
import jax.numpy as jnp
from jax import lax
from jax.experimental import pallas as pl
from jax.experimental.pallas import tpu as pltpu


def _round_up(x, m):
    return ((x + m - 1) // m) * m


def _conv3x3s2_kernel(main_ref, halo_ref, w_ref, b_ref, o_ref):
    """One (batch, H-tile, Cout-tile) step of the stride-2 3x3 conv.

    main_ref: (4, TH, CWp, Cin)  bf16  parity planes, plane rows [t*TH, (t+1)*TH)
    halo_ref: (2, 1,  CWp, Cin)  bf16  plane row (t+1)*TH of the even-row-parity
                                       planes (q = 0, 1); halo for kh == 2
    w_ref:    (9*Cin, TN)        bf16  tap-major (3*kh + kw), cin-minor weights
    b_ref:    (1, TN)            f32
    o_ref:    (1, TH*Wo, TN)
    """
    _, TH, CWp, Cin = main_ref.shape
    Wo = CWp - 1

    planes = [main_ref[q] for q in range(4)]                 # (TH, CWp, Cin) each
    # kh == 2 reads plane rows shifted down by one; only even row-parity planes.
    if TH > 1:
        ext = [jnp.concatenate([planes[q][1:], halo_ref[q]], axis=0)
               for q in range(2)]
    else:
        ext = [halo_ref[0], halo_ref[1]]

    # Fused im2col LHS built once per tile: lane-axis concat of the 9 taps,
    # each a unit-offset slice of one parity plane -> (TH, Wo, 9*Cin).
    taps = []
    for kh in range(3):
        rp = kh & 1
        down = kh == 2
        for kw in range(3):
            cp = kw & 1
            di = 1 if kw == 2 else 0
            src = ext[cp] if down else planes[2 * rp + cp]
            taps.append(src[:, di:di + Wo, :])
    lhs = jnp.concatenate(taps, axis=-1).reshape(TH * Wo, 9 * Cin)

    # Single MXU matmul (K = 9*Cin), f32 accumulate, bias in the epilogue.
    acc = jnp.dot(lhs, w_ref[...], preferred_element_type=jnp.float32)
    o_ref[0] = (acc + b_ref[...]).astype(o_ref.dtype)


def _vmem_budget():
    """(working-set cap for tile sizing, vmem_limit_bytes) per TPU generation."""
    try:
        cap = pltpu.get_tpu_info().vmem_capacity_bytes
    except Exception:
        cap = None
    if cap is None or cap <= 64 * 1024 * 1024:
        # v7x (64 MiB / TensorCore) or unknown: stay conservative.
        return 36 * 1024 * 1024, 40 * 1024 * 1024
    # v5e / v6e: 128 MiB physical VMEM -> use it (fewer, larger grid steps).
    return 88 * 1024 * 1024, 96 * 1024 * 1024


def _pick_block_h(h_out, w_out_p, cin, tn, budget_bytes):
    """Output rows per grid step: target ~2048 matmul rows (amortizes the
    ~0.35 us/step overhead and MXU push/drain), but keep >= 2 H-tiles when the
    image allows so v7x's second TensorCore has parallel work (N*nT*nC should
    stay a multiple of 2 when possible)."""
    cwp = w_out_p + 1
    th = max(1, min(pl.cdiv(h_out, 2), max(1, 2048 // w_out_p)))

    def vmem_bytes(t):
        main_in = 4 * t * cwp * cin * 2        # bf16 parity-plane tile
        halo = 2 * cwp * cin * 2               # 1-row halo, 2 planes
        wgt = 9 * cin * tn * 2                 # bf16 weight tile
        out_t = t * w_out_p * tn * 4           # output tile (f32)
        lhs = t * w_out_p * 9 * cin * 2        # fused-LHS copy built in-kernel
        acc = t * w_out_p * tn * 4             # f32 matmul result
        # inputs/outputs are double-buffered by the pipeline
        return 2 * (main_in + halo + wgt + out_t) + lhs + acc

    while th > 1 and vmem_bytes(th) > budget_bytes:
        th = max(1, th // 2)
    return th


def downsample2d_nhwc(x_nhwc, weight_oihw, bias):
    """NHWC core: equivalent of nn.Conv2d(Cin, Cout, 3, stride=2, padding=1).

    Layout pass is ~1x data: zero-pad + parity split of the padded image into
    4 planes  plane[2*rp+cp][j, i] = x_pad[2j+rp, 2i+cp], so every tap of the
    stride-2 3x3 conv is a unit-offset slice of one plane inside the kernel.
    """
    N, H, W, Cin = x_nhwc.shape
    Cout = weight_oihw.shape[0]
    H_out = (H - 1) // 2 + 1
    W_out = (W - 1) // 2 + 1

    W_out_p = _round_up(W_out, 8)             # sublane-friendly output width
    Cout_p = _round_up(Cout, 128)             # lane-dense output channels
    TN = 256 if Cout_p % 256 == 0 else 128    # Cout tile (weights double-buffer)
    nC = Cout_p // TN

    budget, vmem_limit = _vmem_budget()
    TH = _pick_block_h(H_out, W_out_p, Cin, TN, budget)
    H_out_p = _round_up(H_out, TH)
    nT = H_out_p // TH

    RH = H_out_p + 1                          # plane rows per parity (incl. halo)
    CWp = W_out_p + 1                         # plane cols per parity
    Rp, Cp = 2 * RH, 2 * CWp                  # padded image rows / cols

    # ---- layout pass (plain JAX, ~1x data): zero-pad + parity split ----
    x = jnp.pad(x_nhwc, ((0, 0), (1, Rp - 1 - H), (1, Cp - 1 - W), (0, 0)))
    # planes[n*4 + 2*rp + cp, j, i, c] = x_pad[n, 2j + rp, 2i + cp, c]
    planes = x.reshape(N, RH, 2, CWp, 2, Cin).transpose(0, 2, 4, 1, 3, 5)
    planes = planes.reshape(N * 4, RH, CWp, Cin).astype(jnp.bfloat16)

    # weights: OIHW -> (kh, kw, cin, cout) -> (9*Cin, Cout_p), bf16 (tap-major)
    w = jnp.transpose(weight_oihw, (2, 3, 1, 0)).reshape(9, Cin, Cout)
    w = jnp.pad(w, ((0, 0), (0, 0), (0, Cout_p - Cout)))
    w = w.reshape(9 * Cin, Cout_p).astype(jnp.bfloat16)
    b = jnp.pad(bias, (0, Cout_p - Cout)).reshape(1, Cout_p).astype(jnp.float32)

    out_dtype = x_nhwc.dtype
    # NOTE: for small Cout (< 128) the padded f32 writeback is amplified; a bf16
    # padded output (cast in-kernel, upcast outside) would halve it if needed.
    flops = 2 * N * H_out_p * W_out_p * 9 * Cin * Cout_p
    bytes_accessed = (planes.size * 2 + w.size * 2 + b.size * 4
                      + N * H_out_p * W_out_p * Cout_p * jnp.dtype(out_dtype).itemsize)

    out = pl.pallas_call(
        _conv3x3s2_kernel,
        out_shape=jax.ShapeDtypeStruct((N, H_out_p * W_out_p, Cout_p), out_dtype),
        grid=(N, nT, nC),
        in_specs=[
            # main parity-plane tile (4 planes x TH plane rows)
            pl.BlockSpec((4, TH, CWp, Cin), lambda n, t, c: (n, t, 0, 0)),
            # 1-row halo at plane row (t+1)*TH, even-row-parity planes only
            pl.BlockSpec((2, 1, CWp, Cin), lambda n, t, c: (2 * n, (t + 1) * TH, 0, 0)),
            pl.BlockSpec((9 * Cin, TN), lambda n, t, c: (0, c)),
            pl.BlockSpec((1, TN), lambda n, t, c: (0, c)),
        ],
        out_specs=pl.BlockSpec((1, TH * W_out_p, TN), lambda n, t, c: (n, t, c)),
        compiler_params=pltpu.CompilerParams(
            dimension_semantics=("parallel", "parallel", "parallel"),
            vmem_limit_bytes=vmem_limit,
            allow_input_fusion=[True, True, False, False]),
        cost_estimate=pl.CostEstimate(flops=flops, transcendentals=0,
                                      bytes_accessed=bytes_accessed),
    )(planes, planes, w, b)

    # TODO(synk): for very large Cin (>~2k) add a K grid axis ("arbitrary", last)
    # over 9*Cin with an f32 VMEM scratch accumulator and pl.when init/finalize.
    out = out.reshape(N, H_out_p, W_out_p, Cout_p)[:, :H_out, :W_out, :Cout]
    return out


def downsample2d(x_nchw, weight_oihw, bias):
    """NCHW interface matching the PyTorch module. NHWC models should call
    downsample2d_nhwc directly and skip both full-activation transposes."""
    y = downsample2d_nhwc(jnp.transpose(x_nchw, (0, 2, 3, 1)), weight_oihw, bias)
    return jnp.transpose(y, (0, 3, 1, 2))


if __name__ == "__main__":
    key = jax.random.PRNGKey(0)
    k_x, k_w, k_b = jax.random.split(key, 3)

    N, Cin, Cout, H, W = 2, 4, 8, 16, 16

    x = jax.random.normal(k_x, (N, Cin, H, W), dtype=jnp.float32)
    fan_in = Cin * 3 * 3
    weight = jax.random.normal(k_w, (Cout, Cin, 3, 3), dtype=jnp.float32) / math.sqrt(fan_in)
    bias = jax.random.normal(k_b, (Cout,), dtype=jnp.float32) * 0.1

    y = downsample2d(x, weight, bias)
    jax.block_until_ready(y)
    assert y.shape == (N, Cout, (H - 1) // 2 + 1, (W - 1) // 2 + 1)

    # Reference: f32 conv on bf16-rounded operands (kernel uses bf16 x bf16 -> f32).
    x_bf = x.astype(jnp.bfloat16).astype(jnp.float32)
    w_bf = weight.astype(jnp.bfloat16).astype(jnp.float32)
    y_ref = lax.conv_general_dilated(
        x_bf, w_bf, window_strides=(2, 2), padding=((1, 1), (1, 1)),
        dimension_numbers=("NCHW", "OIHW", "NCHW"),
        precision=lax.Precision.HIGHEST,
    ) + bias.reshape(1, Cout, 1, 1)
    err = float(jnp.max(jnp.abs(y - y_ref)))
    assert jnp.allclose(y, y_ref, atol=1e-2, rtol=1e-2), f"max abs err {err}"

    print("KERNEL_OK")
</pallas_src>

<mosaic_0001>
module attributes {stable_mosaic.version = 11 : i64} {
  func.func @_conv3x3s2_kernel(%arg0: i32, %arg1: i32, %arg2: i32, %arg3: memref<4x4x9x4xbf16, #tpu.memory_space<vmem>>, %arg4: memref<2x1x9x4xbf16, #tpu.memory_space<vmem>>, %arg5: memref<36x128xbf16, #tpu.memory_space<vmem>>, %arg6: memref<1x128xf32, #tpu.memory_space<vmem>>, %arg7: memref<1x32x128xf32, #tpu.memory_space<vmem>>) attributes {dimension_semantics = [#tpu.dimension_semantics<parallel>, #tpu.dimension_semantics<parallel>, #tpu.dimension_semantics<parallel>], iteration_bounds = array<i64: 2, 2, 1>, scalar_prefetch = 0 : i64, scratch_operands = 0 : i64, tpu.core_type = #tpu.core_type<tc>, window_params = [{transform_indices = @transform_0, window_bounds = array<i64: 4, 4, 9, 4>}, {transform_indices = @transform_1, window_bounds = array<i64: 2, 1, 9, 4>}, {transform_indices = @transform_2, window_bounds = array<i64: 36, 128>}, {transform_indices = @transform_3, window_bounds = array<i64: 1, 128>}, {transform_indices = @transform_4, window_bounds = array<i64: 1, 32, 128>}]} {
    %c0 = arith.constant 0 : index
    %c0_0 = arith.constant 0 : index
    %c0_1 = arith.constant 0 : index
    %c0_2 = arith.constant 0 : index
    %0 = vector.load %arg3[%c0, %c0_0, %c0_1, %c0_2] : memref<4x4x9x4xbf16, #tpu.memory_space<vmem>>, vector<1x4x9x4xbf16>
    %1 = vector.shape_cast %0 : vector<1x4x9x4xbf16> to vector<4x9x4xbf16>
    %c1 = arith.constant 1 : index
    %c0_3 = arith.constant 0 : index
    %c0_4 = arith.constant 0 : index
    %c0_5 = arith.constant 0 : index
    %2 = vector.load %arg3[%c1, %c0_3, %c0_4, %c0_5] : memref<4x4x9x4xbf16, #tpu.memory_space<vmem>>, vector<1x4x9x4xbf16>
    %3 = vector.shape_cast %2 : vector<1x4x9x4xbf16> to vector<4x9x4xbf16>
    %c2 = arith.constant 2 : index
    %c0_6 = arith.constant 0 : index
    %c0_7 = arith.constant 0 : index
    %c0_8 = arith.constant 0 : index
    %4 = vector.load %arg3[%c2, %c0_6, %c0_7, %c0_8] : memref<4x4x9x4xbf16, #tpu.memory_space<vmem>>, vector<1x4x9x4xbf16>
    %5 = vector.shape_cast %4 : vector<1x4x9x4xbf16> to vector<4x9x4xbf16>
    %c3 = arith.constant 3 : index
    %c0_9 = arith.constant 0 : index
    %c0_10 = arith.constant 0 : index
    %c0_11 = arith.constant 0 : index
    %6 = vector.load %arg3[%c3, %c0_9, %c0_10, %c0_11] : memref<4x4x9x4xbf16, #tpu.memory_space<vmem>>, vector<1x4x9x4xbf16>
    %7 = vector.shape_cast %6 : vector<1x4x9x4xbf16> to vector<4x9x4xbf16>
    %8 = vector.extract_strided_slice %1 {offsets = [1, 0, 0], sizes = [3, 9, 4], strides = [1, 1, 1]} : vector<4x9x4xbf16> to vector<3x9x4xbf16>
    %c0_12 = arith.constant 0 : index
    %c0_13 = arith.constant 0 : index
    %c0_14 = arith.constant 0 : index
    %c0_15 = arith.constant 0 : index
    %9 = vector.load %arg4[%c0_12, %c0_13, %c0_14, %c0_15] : memref<2x1x9x4xbf16, #tpu.memory_space<vmem>>, vector<1x1x9x4xbf16>
    %10 = vector.shape_cast %9 : vector<1x1x9x4xbf16> to vector<1x9x4xbf16>
    %11 = tpu.concatenate %8, %10 in 0 : vector<3x9x4xbf16>, vector<1x9x4xbf16> -> vector<4x9x4xbf16>
    %12 = vector.extract_strided_slice %3 {offsets = [1, 0, 0], sizes = [3, 9, 4], strides = [1, 1, 1]} : vector<4x9x4xbf16> to vector<3x9x4xbf16>
    %c1_16 = arith.constant 1 : index
    %c0_17 = arith.constant 0 : index
    %c0_18 = arith.constant 0 : index
    %c0_19 = arith.constant 0 : index
    %13 = vector.load %arg4[%c1_16, %c0_17, %c0_18, %c0_19] : memref<2x1x9x4xbf16, #tpu.memory_space<vmem>>, vector<1x1x9x4xbf16>
    %14 = vector.shape_cast %13 : vector<1x1x9x4xbf16> to vector<1x9x4xbf16>
    %15 = tpu.concatenate %12, %14 in 0 : vector<3x9x4xbf16>, vector<1x9x4xbf16> -> vector<4x9x4xbf16>
    %16 = vector.extract_strided_slice %1 {offsets = [0, 0, 0], sizes = [4, 8, 4], strides = [1, 1, 1]} : vector<4x9x4xbf16> to vector<4x8x4xbf16>
    %17 = vector.extract_strided_slice %3 {offsets = [0, 0, 0], sizes = [4, 8, 4], strides = [1, 1, 1]} : vector<4x9x4xbf16> to vector<4x8x4xbf16>
    %18 = vector.extract_strided_slice %1 {offsets = [0, 1, 0], sizes = [4, 8, 4], strides = [1, 1, 1]} : vector<4x9x4xbf16> to vector<4x8x4xbf16>
    %19 = vector.extract_strided_slice %5 {offsets = [0, 0, 0], sizes = [4, 8, 4], strides = [1, 1, 1]} : vector<4x9x4xbf16> to vector<4x8x4xbf16>
    %20 = vector.extract_strided_slice %7 {offsets = [0, 0, 0], sizes = [4, 8, 4], strides = [1, 1, 1]} : vector<4x9x4xbf16> to vector<4x8x4xbf16>
    %21 = vector.extract_strided_slice %5 {offsets = [0, 1, 0], sizes = [4, 8, 4], strides = [1, 1, 1]} : vector<4x9x4xbf16> to vector<4x8x4xbf16>
    %22 = vector.extract_strided_slice %11 {offsets = [0, 0, 0], sizes = [4, 8, 4], strides = [1, 1, 1]} : vector<4x9x4xbf16> to vector<4x8x4xbf16>
    %23 = vector.extract_strided_slice %15 {offsets = [0, 0, 0], sizes = [4, 8, 4], strides = [1, 1, 1]} : vector<4x9x4xbf16> to vector<4x8x4xbf16>
    %24 = vector.extract_strided_slice %11 {offsets = [0, 1, 0], sizes = [4, 8, 4], strides = [1, 1, 1]} : vector<4x9x4xbf16> to vector<4x8x4xbf16>
    %25 = tpu.concatenate %16, %17, %18, %19, %20, %21, %22, %23, %24 in 2 : vector<4x8x4xbf16>, vector<4x8x4xbf16>, vector<4x8x4xbf16>, vector<4x8x4xbf16>, vector<4x8x4xbf16>, vector<4x8x4xbf16>, vector<4x8x4xbf16>, vector<4x8x4xbf16>, vector<4x8x4xbf16> -> vector<4x8x36xbf16>
    %26 = vector.shape_cast %25 : vector<4x8x36xbf16> to vector<32x36xbf16>
    %c0_20 = arith.constant 0 : index
    %c0_21 = arith.constant 0 : index
    %27 = vector.load %arg5[%c0_20, %c0_21] : memref<36x128xbf16, #tpu.memory_space<vmem>>, vector<36x128xbf16>
    %cst = arith.constant dense<0.000000e+00> : vector<32x128xf32>
    %28 = tpu.matmul %26, %27, %cst {dimension_numbers = #tpu.dot_dimension_numbers<[1], [0], [0], [1], [0, 0, 1, 1], [], []>} : vector<32x36xbf16>, vector<36x128xbf16>, vector<32x128xf32> -> vector<32x128xf32>
    %c0_22 = arith.constant 0 : index
    %c0_23 = arith.constant 0 : index
    %29 = vector.load %arg6[%c0_22, %c0_23] : memref<1x128xf32, #tpu.memory_space<vmem>>, vector<1x128xf32>
    %30 = vector.broadcast %29 : vector<1x128xf32> to vector<32x128xf32>
    %31 = arith.addf %28, %30 : vector<32x128xf32>
    %c0_24 = arith.constant 0 : index
    %c0_25 = arith.constant 0 : index
    %c0_26 = arith.constant 0 : index
    %32 = vector.load %arg7[%c0_24, %c0_25, %c0_26] : memref<1x32x128xf32, #tpu.memory_space<vmem>>, vector<1x32x128xf32>
    %33 = vector.shape_cast %32 : vector<1x32x128xf32> to vector<32x128xf32>
    %34 = vector.shape_cast %31 : vector<32x128xf32> to vector<1x32x128xf32>
    tpu.vector_store %arg7[%c0_24, %c0_25, %c0_26], %34 {strides = array<i32>} : memref<1x32x128xf32, #tpu.memory_space<vmem>>, vector<1x32x128xf32>,
    return
  }
  func.func @transform_0(%arg0: i32, %arg1: i32, %arg2: i32) -> (i32, i32, i32, i32) {
    %c0_i32 = arith.constant 0 : i32
    %c0_i32_0 = arith.constant 0 : i32
    %c0_i32_1 = arith.constant 0 : i32
    return %arg0, %arg1, %c0_i32, %c0_i32_0 : i32, i32, i32, i32
  }
  func.func @transform_1(%arg0: i32, %arg1: i32, %arg2: i32) -> (i32, i32, i32, i32) {
    %c2_i32 = arith.constant 2 : i32
    %0 = arith.muli %c2_i32, %arg0 : i32
    %c1_i32 = arith.constant 1 : i32
    %1 = arith.addi %arg1, %c1_i32 : i32
    %c4_i32 = arith.constant 4 : i32
    %2 = arith.muli %1, %c4_i32 : i32
    %c0_i32 = arith.constant 0 : i32
    %c0_i32_0 = arith.constant 0 : i32
    %c0_i32_1 = arith.constant 0 : i32
    return %0, %2, %c0_i32, %c0_i32_0 : i32, i32, i32, i32
  }
  func.func @transform_2(%arg0: i32, %arg1: i32, %arg2: i32) -> (i32, i32) {
    %c0_i32 = arith.constant 0 : i32
    %c0_i32_0 = arith.constant 0 : i32
    return %c0_i32, %arg2 : i32, i32
  }
  func.func @transform_3(%arg0: i32, %arg1: i32, %arg2: i32) -> (i32, i32) {
    %c0_i32 = arith.constant 0 : i32
    %c0_i32_0 = arith.constant 0 : i32
    return %c0_i32, %arg2 : i32, i32
  }
  func.func @transform_4(%arg0: i32, %arg1: i32, %arg2: i32) -> (i32, i32, i32) {
    %c0_i32 = arith.constant 0 : i32
    return %arg0, %arg1, %arg2 : i32, i32, i32
  }
}

</mosaic_0001>

<bundles_post_ra>
// kernel: tpu_custom_call.1
= control target key start
LH: loop header
LB: loop body
LE: loop exit
PB: predicated region body
PF: predicated region fallthrough
CT: control target
= control target key end

     0   :  { %s2222_s0 = inlined_call_operand.vmem [shape: bf16[8,9,9,4], index: 0, kind: input, shape index: {}]   ;;  %s2223_s1 = inlined_call_operand.vmem [shape: bf16[8,9,9,4], index: 1, kind: input, shape index: {}]   ;;  %s2224_s2 = inlined_call_operand.vmem [shape: bf16[36,128], index: 2, kind: input, shape index: {}]   ;;  %s2225_s3 = inlined_call_operand.vmem [shape: f32[1,128], index: 3, kind: input, shape index: {}]   ;;  %s2226_s4 = inlined_call_operand.hbm [shape: f32[2,64,128], index: 4, kind: output, shape index: {}]  }
   0x1   :  { %2231 = sst [smem:[#allocation11_spill]] %s2222_s0 }
   0x2   :  { %2232 = sst [smem:[#allocation12_spill]] %s2225_s3 }
   0x3   :  { %2233 = sst [smem:[#allocation13_spill]] %s2226_s4 }
   0x4   :  { %9 = vsyncpa [#allocation5], 0 }
   0x5   :  { %11 = vsyncpa [#allocation5 + $0x1], 0  ;;  %s1785_s15 = smov 0   ;;  %s1787_s16 = smov 0  }
   0x6   :  { %s1789_s17 = smov 0   ;;  %s1791_s18 = smov 0  }
   0x7   :  { %s1793_s19 = smov 0   ;;  %s1795_s20 = smov 0  }
   0x8   :  { %s1797_s21 = smov 0   ;;  %s1799_s22 = smov 0  }
   0x9   :  { %s1801_s23 = smov 0   ;;  %s1803_s24 = smov 0  }
   0xa LB: > { %2234 = sst [smem:[#allocation7_spill]] %s1712_s19  ;;  %s32_s27 = sadd.s32 1, %s1724_s22  ;;  %s1732_s24 = sphi %s1803_s24, %s17_s24   ;;  %s1728_s23 = sphi %s1801_s23, %s2261_s23   ;;  %s1724_s22 = sphi %s1799_s22, %s2260_s22   ;;  %s1720_s21 = sphi %s1797_s21, %s2259_s21   ;;  %s1716_s20 = sphi %s1795_s20, %s2258_s20   ;;  %s1712_s19 = sphi %s1793_s19, %s2251_s19   ;;  %s1708_s18 = sphi %s1791_s18, %s2257_s18   ;;  %s1704_s17 = sphi %s1789_s17, %s2256_s17   ;;  %s1700_s16 = sphi %s1787_s16, %s2255_s16   ;;  %s1696_s15 = sphi %s1785_s15, %s2254_s15  }
   0xb   : > { %s36_s28 = sadd.s32 1, %s1728_s23  ;;  %p34_p0 = scmp.ge.s32.totalorder %s32_s27, 2 }
   0xc   : > { %s45_s29 = sadd.s32 1, %s1712_s19  ;;  %p52_p1 = scmp.ne.s32.totalorder %s1712_s19, %s1708_s18 }
   0xd   : > { %p53_p2 = scmp.eq.s32.totalorder %s1732_s24, 0  ;;  %s2263_s27 = smov (%p34_p0, %s32_s27), 0 }
   0xe   : > { %2235 = sst [smem:[#allocation8_spill]] %s2263_s27  ;;  %s2265_s28 = smov (!%p34_p0, %s36_s28), %s1728_s23 }
   0xf   : > { %s41_s30 = ssub.s32 %s1724_s22, %s2263_s27  ;;  %p1853_p3 = por %p53_p2, %p52_p1 }
  0x10   : > { %p38_p4 = scmp.ge.s32.totalorder %s2265_s28, 2  ;;  %s1275_s6 = sshll.u32 %s1728_s23, 1 }
  0x11   : > { %s1371_s7 = sshll.u32 %s1724_s22, 2  ;;  %s1373_s8 = sshll.u32 %s2263_s27, 2 }
  0x12   : > { %s2267_s28 = smov (%p38_p4, %s2265_s28), 0  ;;  %s1372_s9 = sadd.s32 4, %s1371_s7 }
  0x13   : > { %2237 = sst [smem:[#allocation9_spill]] %s2267_s28  ;;  %s1374_s10 = sadd.s32 4, %s1373_s8 }
  0x14   : > { %s40_s11 = ssub.s32 %s1728_s23, %s2267_s28  ;;  %s1277_s12 = sshll.u32 %s2267_s28, 1 }
  0x15   : > { %s42_s13 = sor.u32 %s41_s30, %s40_s11  ;;  %s74_s14 = ssub.s32 %s1275_s6, %s1277_s12 }
  0x16   : > { %p43_p5 = scmp.eq.s32.totalorder %s42_s13, 0  ;;  %s75_s26 = ssub.s32 %s1372_s9, %s1374_s10 }
  0x17   : > { %s76_s25 = sor.u32 %s75_s26, %s74_s14  ;;  %s79_s27 = sadd.s32 1, %s1704_s17 }
  0x18   : > { %s1867_s4 = scalar_select %p43_p5, %s1712_s19, %s45_s29  }
  0x19   : > { %p77_p6 = scmp.eq.s32.totalorder %s76_s25, 0  ;;  %p86_p7 = scmp.ne.s32.totalorder %s1704_s17, %s1700_s16 }
  0x1a   : > { %2238 = sst [smem:[#allocation10_spill]] %s1867_s4  ;;  %s2239_s3 = sadd.s32 4294967295, %s1732_s24  }
  0x1b   : > { %p172_p8 = scmp.eq.s32.totalorder %s2239_s3, 3  ;;  %p177_p9 = scmp.ne.s32.totalorder %s1708_s18, %s1696_s15 }
  0x1c   : > { %s1876_s7 = scalar_select %p77_p6, %s1704_s17, %s79_s27  }
  0x1d   : > { %p1880_p10 = por %p86_p7, %p53_p2  ;;  %p1887_p11 = por %p172_p8, %p52_p1 }
  0x1e   : > { %s2242_s26 = sadd.s32 4294967294, %s1732_s24   ;;  %p1282_p0 = scmp.ge.s32.totalorder %s1732_s24, 4 }
  0x1f   : > { %p178_p12 = scmp.eq.s32.totalorder %s2242_s26, 3 }
  0x20   : > { %207 = sbr.rel (%p1282_p0) target bundleno = 91 (0x5b), region = 24 }
  0x21   : > { %p1893_p13 = por %p178_p12, %p177_p9 }
  0x27   : > { %210 = sbr.rel (!%p1853_p3) target bundleno = 82 (0x52), region = 28  ;;  %s212_s3 = sand.u32 (%p1853_p3), 1, %s1712_s19  }
  0x28   : > { %s1901_s27 = sshll.u32 (%p1853_p3), %s212_s3, 7  ;;  %s1376_s29 = sshll.u32 (%p1853_p3), %s1724_s22, 3 }
  0x29   : > { %s1395_s6 = smul.u32 (%p1853_p3), 72, %s1728_s23  ;;  %s2244_s0 = sld [smem:[#allocation11_spill]] (%p1853_p3) }
  0x2a   : > { %s214_s14 = scalar_lea.vmem (%p1853_p3), [#allocation2], %s1901_s27   ;;  %s1918_s3 = smov (%p1853_p3), 0  }
  0x2b   : > { %s225_s9 = sadd.s32 (%p1853_p3), %s1395_s6, %s1376_s29  ;;  %s2245_s5 = smov (%p1853_p3), %s214_s14 }
  0x2c   : > { %s1291_s10 = sshll.u32 (%p1853_p3), %s225_s9, 2  ;;  %s1920_s28 = smov (%p1853_p3), 0  }
  0x2f   : > { %s1908_s13 = scalar_lea.vmem %s2244_s0, %s1291_s10  }
  0x30   : > { %s2246_s26 = smov %s1908_s13 }
  0x31 LB: >> { %v247_v0 = vld [vmem:[%s1740_s26] sm:$0xf]  ;;  %v249_v1 = vld [vmem:[%s1740_s26 + $0x4] sm:$0xf]  ;;  %v251_v2 = vld [vmem:[%s1740_s26 + $0x8] sm:$0xf]  ;;  %s1748_s28 = sphi %s1920_s28, %s241_s28   ;;  %s1744_s3 = sphi %s1918_s3, %s2247_s3   ;;  %s1740_s26 = sphi %s2246_s26, %s316_s26   ;;  %s1736_s5 = sphi %s2245_s5, %s317_s5  }
  0x32   : >> { %248 = vst [vmem:[%s1736_s5] sm:$0xf] %v247_v0  ;;  %250 = vst [vmem:[%s1736_s5 + $0x4] sm:$0xf] %v249_v1  ;;  %v253_v3 = vld [vmem:[%s1740_s26 + $0xc] sm:$0xf]  ;;  %s311_s29 = sadd.s32 1, %s1744_s3 }
  0x33   : >> { %252 = vst [vmem:[%s1736_s5 + $0x8] sm:$0xf] %v251_v2  ;;  %v255_v4 = vld [vmem:[%s1740_s26 + $0x10] sm:$0xf]  ;;  %v257_v5 = vld [vmem:[%s1740_s26 + $0x14] sm:$0xf] }
  0x34   : >> { %254 = vst [vmem:[%s1736_s5 + $0xc] sm:$0xf] %v253_v3  ;;  %256 = vst [vmem:[%s1736_s5 + $0x10] sm:$0xf] %v255_v4  ;;  %v259_v6 = vld [vmem:[%s1740_s26 + $0x18] sm:$0xf] }
  0x35   : >> { %258 = vst [vmem:[%s1736_s5 + $0x14] sm:$0xf] %v257_v5  ;;  %v261_v7 = vld [vmem:[%s1740_s26 + $0x1c] sm:$0xf]  ;;  %v263_v8 = vld [vmem:[%s1740_s26 + $0x48] sm:$0xf] }
  0x36   : >> { %260 = vst [vmem:[%s1736_s5 + $0x18] sm:$0xf] %v259_v6  ;;  %262 = vst [vmem:[%s1736_s5 + $0x1c] sm:$0xf] %v261_v7  ;;  %v265_v9 = vld [vmem:[%s1740_s26 + $0x4c] sm:$0xf] }
  0x37   : >> { %264 = vst [vmem:[%s1736_s5 + $0x20] sm:$0xf] %v263_v8  ;;  %v267_v10 = vld [vmem:[%s1740_s26 + $0x50] sm:$0xf]  ;;  %v269_v11 = vld [vmem:[%s1740_s26 + $0x54] sm:$0xf] }
  0x38   : >> { %266 = vst [vmem:[%s1736_s5 + $0x24] sm:$0xf] %v265_v9  ;;  %268 = vst [vmem:[%s1736_s5 + $0x28] sm:$0xf] %v267_v10  ;;  %v271_v12 = vld [vmem:[%s1740_s26 + $0x58] sm:$0xf] }
  0x39   : >> { %270 = vst [vmem:[%s1736_s5 + $0x2c] sm:$0xf] %v269_v11  ;;  %v273_v13 = vld [vmem:[%s1740_s26 + $0x5c] sm:$0xf]  ;;  %v275_v14 = vld [vmem:[%s1740_s26 + $0x60] sm:$0xf] }
  0x3a   : >> { %272 = vst [vmem:[%s1736_s5 + $0x30] sm:$0xf] %v271_v12  ;;  %274 = vst [vmem:[%s1736_s5 + $0x34] sm:$0xf] %v273_v13  ;;  %v277_v15 = vld [vmem:[%s1740_s26 + $0x64] sm:$0xf] }
  0x3b   : >> { %276 = vst [vmem:[%s1736_s5 + $0x38] sm:$0xf] %v275_v14  ;;  %v279_v16 = vld [vmem:[%s1740_s26 + $0x90] sm:$0xf]  ;;  %v281_v17 = vld [vmem:[%s1740_s26 + $0x94] sm:$0xf] }
  0x3c   : >> { %278 = vst [vmem:[%s1736_s5 + $0x3c] sm:$0xf] %v277_v15  ;;  %280 = vst [vmem:[%s1736_s5 + $0x40] sm:$0xf] %v279_v16  ;;  %v283_v18 = vld [vmem:[%s1740_s26 + $0x98] sm:$0xf] }
  0x3d   : >> { %282 = vst [vmem:[%s1736_s5 + $0x44] sm:$0xf] %v281_v17  ;;  %v285_v19 = vld [vmem:[%s1740_s26 + $0x9c] sm:$0xf]  ;;  %v287_v20 = vld [vmem:[%s1740_s26 + $0xa0] sm:$0xf] }
  0x3e   : >> { %284 = vst [vmem:[%s1736_s5 + $0x48] sm:$0xf] %v283_v18  ;;  %286 = vst [vmem:[%s1736_s5 + $0x4c] sm:$0xf] %v285_v19  ;;  %v289_v21 = vld [vmem:[%s1740_s26 + $0xa4] sm:$0xf] }
  0x3f   : >> { %288 = vst [vmem:[%s1736_s5 + $0x50] sm:$0xf] %v287_v20  ;;  %v291_v22 = vld [vmem:[%s1740_s26 + $0xa8] sm:$0xf]  ;;  %v293_v23 = vld [vmem:[%s1740_s26 + $0xac] sm:$0xf] }
  0x40   : >> { %290 = vst [vmem:[%s1736_s5 + $0x54] sm:$0xf] %v289_v21  ;;  %292 = vst [vmem:[%s1736_s5 + $0x58] sm:$0xf] %v291_v22  ;;  %v295_v24 = vld [vmem:[%s1740_s26 + $0xd8] sm:$0xf] }
  0x41   : >> { %294 = vst [vmem:[%s1736_s5 + $0x5c] sm:$0xf] %v293_v23  ;;  %v297_v25 = vld [vmem:[%s1740_s26 + $0xdc] sm:$0xf]  ;;  %v299_v26 = vld [vmem:[%s1740_s26 + $0xe0] sm:$0xf] }
  0x42   : >> { %296 = vst [vmem:[%s1736_s5 + $0x60] sm:$0xf] %v295_v24  ;;  %298 = vst [vmem:[%s1736_s5 + $0x64] sm:$0xf] %v297_v25  ;;  %v301_v27 = vld [vmem:[%s1740_s26 + $0xe4] sm:$0xf] }
  0x43   : >> { %300 = vst [vmem:[%s1736_s5 + $0x68] sm:$0xf] %v299_v26  ;;  %v303_v28 = vld [vmem:[%s1740_s26 + $0xe8] sm:$0xf]  ;;  %v305_v29 = vld [vmem:[%s1740_s26 + $0xec] sm:$0xf] }
  0x44   : >> { %302 = vst [vmem:[%s1736_s5 + $0x6c] sm:$0xf] %v301_v27  ;;  %304 = vst [vmem:[%s1736_s5 + $0x70] sm:$0xf] %v303_v28  ;;  %v307_v30 = vld [vmem:[%s1740_s26 + $0xf0] sm:$0xf] }
  0x45   : >> { %306 = vst [vmem:[%s1736_s5 + $0x74] sm:$0xf] %v305_v29  ;;  %v309_v31 = vld [vmem:[%s1740_s26 + $0xf4] sm:$0xf]  ;;  %308 = vst [vmem:[%s1736_s5 + $0x78] sm:$0xf] %v307_v30 }
  0x46   : >> { %310 = vst [vmem:[%s1736_s5 + $0x7c] sm:$0xf] %v309_v31  ;;  %p312_p1 = scmp.ge.s32.totalorder %s311_s29, 1  ;;  %s241_s28 = sadd.s32 1, %s1748_s28  }
  0x47   : >> { %p240_p2 = scmp.ge.s32.totalorder %s241_s28, 1 }
  0x48   : >> { %s2269_s29 = smov (%p312_p1, %s311_s29), 0 }
  0x49   : >> { %s1295_s6 = sshll.u32 %s2269_s29, 5  ;;  %s2247_s3 = smov %s2269_s29 }
  0x4a   : >> { %s316_s26 = scalar_lea.vmem %s1908_s13, %s1295_s6   ;;  %s317_s5 = scalar_lea.vmem %s214_s14, %s1295_s6 [#allocation2]  }
  0x4b   : > { %243 = sbr.rel (!%p240_p2) target bundleno = 49 (0x31), region = 211 }
  0x52 PF: > { %507 = sbr.rel (!%p1880_p10) target bundleno = 91 (0x5b), region = 90  ;;  %s509_s9 = sand.u32 (%p1880_p10), 1, %s1704_s17  }
  0x53   : > { %s1304_s10 = sshll.u32 (%p1880_p10), %s1724_s22, 3  ;;  %s1303_s11 = sshll.u32 (%p1880_p10), %s509_s9, 4 }
  0x54   : > { %s1148_s12 = smul.u32 (%p1880_p10), 72, %s1728_s23  ;;  %s511_s28 = scalar_lea.vmem (%p1880_p10), [#allocation3], %s1303_s11 }
  0x56   : > { %s1149_s6 = sadd.s32 (%p1880_p10), %s1304_s10, %s1148_s12 }
  0x57   : > { %s1305_s0 = sshll.u32 (%p1880_p10), %s1149_s6, 2 }
  0x58   : > { %s1151_s29 = scalar_lea.vmem (%p1880_p10), %s2223_s1, %s1305_s0 }
  0x59   : > { %v1306_v32 = vld [vmem:[%s1151_s29 + $0x20] sm:$0xff]   ;;  %v1308_v33 = vld [vmem:[%s1151_s29 + $0x68] sm:$0xff]  }
  0x5a   : > { %537 = vst [vmem:[%s511_s28] sm:$0xff] %v1306_v32   ;;  %541 = vst [vmem:[%s511_s28 + $0x8] sm:$0xff] %v1308_v33  }
  0x5b PF: > { %p1310_p3 = scmp.ge.s32.totalorder %s1732_s24, 1  ;;  %p573_p4 = scmp.lt.s32.totalorder %s1732_s24, 5 }
  0x5d   : > { %p574_p5 = pnand %p1310_p3, %p573_p4 }
  0x5e   : > { %s2022_s8 = sand.u32 (!%p574_p5), 1, %s1708_s18   ;;  %s1750_s0 = smov (!%p574_p5), 4   ;;  %vm1001_vm0 = vcmask (!%p574_p5), 1041408   ;;  %vm881_vm1 = vcmask (!%p574_p5), 31744   ;;  %vm894_vm2 = vcmask (!%p574_p5), 64512   ;;  %vm903_vm3 = vcmask (!%p574_p5), 97280  }
  0x5f   : > { %577 = sbr.rel (%p574_p5) target bundleno = 510 (0x1fe), region = 131  ;;  %s1311_s27 = sshll.u32 (!%p574_p5), %s2022_s8, 7  ;;  %vm912_vm4 = vcmask (!%p574_p5), 130048   ;;  %vm921_vm5 = vcmask (!%p574_p5), 162816   ;;  %vm930_vm6 = vcmask (!%p574_p5), 195584   ;;  %vm939_vm7 = vcmask (!%p574_p5), 228352  }
  0x60   : > { %s2025_s4 = scalar_lea.vmem (!%p574_p5), [#allocation2], %s1311_s27  ;;  %s1751_s19 = smov (!%p574_p5), 8   ;;  %vm948_vm8 = vcmask (!%p574_p5), 261120   ;;  %vm994_vm9 = vcmask (!%p574_p5), 293888  }
  0x61   : > { %v2028_v34 = vld [vmem:[%s2025_s4 + $0x30] ss:$0 sps:$4 sm:$0xff] (!%p574_p5)   ;;  %v1557_v35 = vld [vmem:[%s2025_s4 + $0x20] ss:$0 sps:$4 sm:$0xff] (!%p574_p5)   ;;  %v2032_v36 = vld [vmem:[%s2025_s4 + $0x38] ss:$0 sps:$4 sm:$0xff] (!%p574_p5)  }
  0x62   : > { %690 = vrot.lane.b32.xlu1 (!%p574_p5), %v2028_v34, %s1750_s0  ;;  %v2036_v37 = vld [vmem:[%s2025_s4 + $0x28] ss:$0 sps:$4 sm:$0xff] (!%p574_p5)   ;;  %686 = vrot.lane.b32.xlu0 (!%p574_p5), %v1557_v35, %s1750_s0  ;;  %v646_v39 = vld [vmem:[%s2025_s4 + $0xc] sm:$0x1] (!%p574_p5)  ;;  %s587_s13 = sand.u32 (!%p574_p5), 1, %s1700_s16   ;;  %s1752_s16 = smov (!%p574_p5), 12  }
  0x63   : > { %v2039_v38 = vld [vmem:[%s2025_s4 + $0x8] sm:$0xf] (!%p574_p5)  ;;  %v2043_v40 = vld [vmem:[%s2025_s4] sm:$0xf] (!%p574_p5)  ;;  %v644_v41 = vld [vmem:[%s2025_s4 + $0x4] sm:$0x1] (!%p574_p5) }
  0x64   : > { %v1336_v42 = vcombine.low (!%p574_p5), %v2039_v38, %v646_v39  ;;  %v1335_v43 = vcombine.low (!%p574_p5), %v2043_v40, %v644_v41  ;;  %v2049_v44 = vld [vmem:[%s2025_s4 + $0x18] sm:$0xf] (!%p574_p5)  ;;  %v650_v45 = vld [vmem:[%s2025_s4 + $0x1c] sm:$0x1] (!%p574_p5)  ;;  %v2053_v46 = vld [vmem:[%s2025_s4 + $0x10] sm:$0xf] (!%p574_p5) }
  0x65   : > { %v1338_v47 = vcombine.low (!%p574_p5), %v2049_v44, %v650_v45  ;;  %v648_v48 = vld [vmem:[%s2025_s4 + $0x14] sm:$0x1] (!%p574_p5)  ;;  %v1320_v2 = vld [vmem:[%s2025_s4 + $0x48] sm:$0xf] (!%p574_p5)  ;;  %v1318_v3 = vld [vmem:[%s2025_s4 + $0x40] sm:$0xf] (!%p574_p5)  ;;  %v1352_v45 = vcombine.low (!%p574_p5), %v2053_v46, %v2053_v46 }
  0x66   : > { %692 = vrot.lane.b32.xlu1 %v2032_v36, %s1750_s0  ;;  %v722_v49 = vshrl.u32 %v1336_v42, 16  ;;  %v724_v50 = vshll.u32 %v1336_v42, 16  ;;  %v715_v51 = vshrl.u32 %v1335_v43, 16  ;;  %v717_v52 = vshll.u32 %v1335_v43, 16  ;;  %688 = vrot.lane.b32.xlu0 %v2036_v37, %s1750_s0  ;;  %s1312_s14 = sshll.u32 %s587_s13, 4  ;;  %s1753_s26 = smov 16  }
  0x67   : > { %v738_v53 = vshll.u32 %v1338_v47, 16  ;;  %v1337_v54 = vcombine.low %v2053_v46, %v648_v48  ;;  %v736_v57 = vshrl.u32 %v1338_v47, 16  ;;  %v1321_v4 = vld [vmem:[%s2025_s4 + $0x4c] sm:$0x1]  ;;  %v1340_v5 = vcombine.low %v1320_v2, %v1320_v2  ;;  %v1319_v6 = vld [vmem:[%s2025_s4 + $0x44] sm:$0x1] }
  0x68   : > { %v726_v55 = vrot.slane %v724_v50, 1  ;;  %v719_v56 = vrot.slane %v717_v52, 1  ;;  %v1339_v7 = vcombine.low %v1318_v3, %v1318_v3  ;;  %v1324_v8 = vld [vmem:[%s2025_s4 + $0x58] sm:$0xf]  ;;  %v1322_v9 = vld [vmem:[%s2025_s4 + $0x50] sm:$0xf]  ;;  %v1348_v10 = vcombine.low %v1320_v2, %v1321_v4 }
  0x69   : > { %v740_v58 = vrot.slane %v738_v53, 1  ;;  %v729_v59 = vshrl.u32 %v1337_v54, 16  ;;  %v731_v60 = vshll.u32 %v1337_v54, 16  ;;  %s2080_s5 = scalar_lea.vmem [#allocation3], %s1312_s14  ;;  %v1347_v11 = vcombine.low %v1318_v3, %v1319_v6  ;;  %v1325_v14 = vld [vmem:[%s2025_s4 + $0x5c] sm:$0x1] }
  0x6a   : > { %v2060_v61 = vor.u32 %v726_v55, %v722_v49  ;;  %v720_v62 = vor.u32 %v719_v56, %v715_v51  ;;  %v1342_v12 = vcombine.low %v1324_v8, %v1324_v8  ;;  %v1341_v13 = vcombine.low %v1322_v9, %v1322_v9  ;;  %v1323_v15 = vld [vmem:[%s2025_s4 + $0x54] sm:$0x1]  ;;  %v1572_v18 = vld [vmem:[%s2025_s4 + $0x68] ss:$0 sps:$4 sm:$0xff]   ;;  %v1573_v19 = vld [vmem:[%s2025_s4 + $0x60] ss:$0 sps:$4 sm:$0xff]  }
  0x6b   : > { %v733_v63 = vrot.slane %v731_v60, 1  ;;  %v2065_v0 = vor.u32 %v740_v58, %v736_v57  ;;  %v1350_v16 = vcombine.low %v1324_v8, %v1325_v14  ;;  %v1349_v17 = vcombine.low %v1322_v9, %v1323_v15  ;;  %v1574_v22 = vld [vmem:[%s2025_s4 + $0x78] ss:$0 sps:$4 sm:$0xff]   ;;  %v1575_v25 = vld [vmem:[%s2025_s4 + $0x70] ss:$0 sps:$4 sm:$0xff]   ;;  %s1754_s3 = smov 20  }
  0x6c   : > { %744 = vrot.lane.b32.xlu1 %v2060_v61, %s1751_s19  ;;  %742 = vrot.lane.b32.xlu0 %v720_v62, %s1751_s19  ;;  %v812_v20 = vshll.u32 %v1348_v10, 16  ;;  %v805_v21 = vshll.u32 %v1347_v11, 16  ;;  %v810_v23 = vshrl.u32 %v1348_v10, 16  ;;  %v803_v24 = vshrl.u32 %v1347_v11, 16  ;;  %v1582_v43 = vld [vmem:[%s2224_s2] sm:$0xff]   ;;  %v1583_v49 = vld [vmem:[%s2224_s2 + $0x8] sm:$0xff]  }
  0x6d   : > { %v2067_v1 = vor.u32 %v733_v63, %v729_v59  ;;  %v826_v28 = vshll.u32 %v1350_v16, 16  ;;  %v819_v29 = vshll.u32 %v1349_v17, 16  ;;  %v824_v30 = vshrl.u32 %v1350_v16, 16  ;;  %v670_v48 = vld [vmem:[%s2080_s5] sm:$0xf]  ;;  %1384 = vmatprep.subr.bf16.mxu0 %v1582_v43  ;;  %s1755_s6 = smov 24  }
  0x6e   : > { %v814_v26 = vrot.slane %v812_v20, 1  ;;  %v807_v27 = vrot.slane %v805_v21, 1  ;;  %v817_v31 = vshrl.u32 %v1349_v17, 16  ;;  %v1351_v47 = vcombine.low %v2039_v38, %v2039_v38  ;;  %1385 = vmatpush3.bf16.msra.mxu0 %v1582_v43  ;;  %v671_v52 = vld [vmem:[%s2080_s5 + $0x4] sm:$0x1]  ;;  %s1756_s27 = smov 28  }
  0x6f   : > { %v828_v35 = vrot.slane %v826_v28, 1  ;;  %v821_v39 = vrot.slane %v819_v29, 1  ;;  %v1354_v50 = vcombine.low %v670_v48, %v670_v48  ;;  %v1353_v51 = vcombine.low %v2049_v44, %v2049_v44  ;;  %1386 = vmatprep.subr.bf16.mxu0 %v1583_v49  ;;  %v1584_v53 = vld [vmem:[%s2224_s2 + $0x10] ss:$0 sps:$4 sm:$0x33]   ;;  %s1757_s4 = smov 32  }
  0x70   : > { %748 = vrot.lane.b32.xlu1 %v2065_v0, %s1751_s19  ;;  %746 = vrot.lane.b32.xlu0 %v2067_v1, %s1751_s19  ;;  %v815_v32 = vor.u32 %v814_v26, %v810_v23  ;;  %v808_v33 = vor.u32 %v807_v27, %v803_v24  ;;  %v1356_v54 = vcombine.low %v670_v48, %v671_v52  ;;  %v1003_v55 = vsel %vm1001_vm0, %v1584_v53, 0  ;;  %v1581_v56 = vld [vmem:[%s2080_s5 + $0x8] ss:$0 sps:$4 sm:$0xff]   ;;  %s1366_s0 = sshll.u32 %s1716_s20, 2  ;;  %s1367_s13 = sshll.u32 %s1720_s21, 3 }
  0x71   : > { %v829_v41 = vor.u32 %v828_v35, %v824_v30  ;;  %v822_v42 = vor.u32 %v821_v39, %v817_v31  ;;  %s1313_s14 = sshll.u32 %s2022_s8, 5  ;;  %s2249_s12 = sld [smem:[#allocation13_spill]] }
  0x72   : > { %1387 = vmatpush3.bf16.msra.mxu0 %v1583_v49  ;;  %v869_v57 = vshll.u32 %v1356_v54, 16  ;;  %v867_v58 = vshrl.u32 %v1356_v54, 16  ;;  %s622_s9 = scalar_lea.vmem [#allocation4], %s1313_s14  ;;  %s1059_s29 = scalar_lea.sflag [#allocation5], %s2022_s8 }
  0x73   : > { %1394 = vmatprep.subr.msk.bf16.mxu0 %vm1001_vm0, %v1584_v53  ;;  %s1075_s10 = sshll.u32 %s622_s9, 4  ;;  %s2156_s10 = int_to_ptr.vmem [resolvable:$true] %s1075_s10 }
  0x74   : > { %764 = vrot.lane.b32.xlu1 %v1340_v5, %s1752_s16  ;;  %762 = vrot.lane.b32.xlu0 %v1339_v7, %s1752_s16  ;;  %v871_v59 = vrot.slane %v869_v57, 1  ;;  %s1585_s28 = scalar_lea.vmem %s2156_s10, 512 }
  0x75   : > { %p1586_p6 = scmp.ne.s32.totalorder %s2156_s10, %s1585_s28 }
  0x76   : > { %1389 = vmatpush3.bf16.msra.mxu0 %v1003_v55  ;;  %v872_v60 = vor.u32 %v871_v59, %v867_v58 }
  0x77   : > { %p1587_p7 = pnand %p1586_p6, %p1887_p11 }
  0x78   : > { %768 = vrot.lane.b32.xlu1 %v1342_v12, %s1752_s16  ;;  %766 = vrot.lane.b32.xlu0 %v1341_v13, %s1752_s16 }
  0x79   : > { %p1588_p8 = pneg %p1587_p7 }
  0x7c   : > { %784 = vrot.lane.b32.xlu1 %v1572_v18, %s1753_s26  ;;  %782 = vrot.lane.b32.xlu0 %v1573_v19, %s1753_s26 }
  0x80   : > { %788 = vrot.lane.b32.xlu1 %v1574_v22, %s1753_s26  ;;  %786 = vrot.lane.b32.xlu0 %v1575_v25, %s1753_s26  ;;  %s2248_s26 = sld [smem:[#allocation12_spill]] }
  0x84   : > { %832 = vrot.lane.b32.xlu1 %v815_v32, %s1754_s3  ;;  %830 = vrot.lane.b32.xlu0 %v808_v33, %s1754_s3 }
  0x88   : > { %836 = vrot.lane.b32.xlu1 %v829_v41, %s1754_s3  ;;  %834 = vrot.lane.b32.xlu0 %v822_v42, %s1754_s3  ;;  %s1072_s3 = sadd.s32 %s1367_s13, %s1366_s0 }
  0x89   : > { %s1368_s11 = sshll.u32 %s1072_s3, 7 }
  0x8c   : > { %846 = vrot.lane.b32.xlu1 %v1352_v45, %s1755_s6  ;;  %844 = vrot.lane.b32.xlu0 %v1351_v47, %s1755_s6 }
  0x90   : > { %850 = vrot.lane.b32.xlu1 %v1354_v50, %s1755_s6  ;;  %848 = vrot.lane.b32.xlu0 %v1353_v51, %s1755_s6  ;;  %s2161_s6 = scalar_lea.hbm %s2249_s12, %s1368_s11 }
  0x94   : > { %857 = vrot.lane.b32.xlu1 %v2028_v34, %s1756_s27  ;;  %855 = vrot.lane.b32.xlu0 %v2036_v37, %s1756_s27 }
  0x98   : > { %861 = vrot.lane.b32.xlu1 %v1581_v56, %s1756_s27  ;;  %859 = vrot.lane.b32.xlu0 %v2032_v36, %s1756_s27  ;;  %s1758_s27 = smov [#allocation4]  }
  0x9c   : > { %875 = vrot.lane.b32.xlu1 %v2067_v1, %s1757_s4  ;;  %873 = vrot.lane.b32.xlu0 %v2060_v61, %s1757_s4 }
  0xa0   : > { %879 = vrot.lane.b32.xlu1 %v872_v60, %s1757_s4  ;;  %877 = vrot.lane.b32.xlu0 %v2065_v0, %s1757_s4  ;;  %s1589_s4 = sshll.u32 %s1758_s27, 4  ;;  %s1590_s4 = int_to_ptr.vmem [resolvable:$false] %s1589_s4 }
  0xa1   : > { %s1591_s0 = scalar_lea.vmem %s1590_s4, 1024  ;;  %p1592_p9 = scmp.lt.s32.totalorder %s2156_s10, %s1590_s4 }
  0xa2   : > { %p1593_p10 = scmp.lt.s32.totalorder %s1591_s0, %s1585_s28 }
  0xa4   : > { %p1594_p12 = por %p1593_p10, %p1592_p9 }
  0xa6   : > { %p1595_p0 = pnand %p1594_p12, %p1588_p8 }
  0xd4   : > { %v691_v62 = vpop.permute.xlu1 %690  ;;  %v687_v34 = vpop.permute.xlu0 %686 }
  0xd5   : > { %v884_v20 = vsel %vm881_vm1, %v2043_v40, %v687_v34 }
  0xd8   : > { %v693_v63 = vpop.permute.xlu1 %692  ;;  %v689_v37 = vpop.permute.xlu0 %688 }
  0xd9   : > { %v887_v21 = vsel %vm881_vm1, %v2039_v38, %v689_v37  ;;  %v890_v38 = vsel %vm881_vm1, %v2053_v46, %v691_v62  ;;  %v893_v29 = vsel %vm881_vm1, %v2049_v44, %v693_v63  ;;  %v1357_v63 = vld [vmem:[%s2248_s26] ss:$0 sm:$0xff] }
  0xde   : > { %v745_v2 = vpop.permute.xlu1 %744  ;;  %v743_v3 = vpop.permute.xlu0 %742 }
  0xdf   : > { %v898_v22 = vsel %vm894_vm2, %v887_v21, %v745_v2  ;;  %v896_v23 = vsel %vm894_vm2, %v884_v20, %v743_v3 }
  0xe2   : > { %v749_v4 = vpop.permute.xlu1 %748  ;;  %v747_v5 = vpop.permute.xlu0 %746 }
  0xe3   : > { %v902_v32 = vsel %vm894_vm2, %v893_v29, %v749_v4  ;;  %v900_v33 = vsel %vm894_vm2, %v890_v38, %v747_v5 }
  0xe6   : > { %v765_v36 = vpop.permute.xlu1 %764  ;;  %v763_v6 = vpop.permute.xlu0 %762 }
  0xe7   : > { %v907_v24 = vsel %vm903_vm3, %v898_v22, %v765_v36  ;;  %v905_v25 = vsel %vm903_vm3, %v896_v23, %v763_v6 }
  0xea   : > { %v769_v7 = vpop.permute.xlu1 %768  ;;  %v767_v8 = vpop.permute.xlu0 %766 }
  0xeb   : > { %v911_v41 = vsel %vm903_vm3, %v902_v32, %v769_v7  ;;  %v909_v42 = vsel %vm903_vm3, %v900_v33, %v767_v8 }
  0xee   : > { %v785_v9 = vpop.permute.xlu1 %784  ;;  %v783_v1 = vpop.permute.xlu0 %782 }
  0xef   : > { %v916_v28 = vsel %vm912_vm4, %v907_v24, %v785_v9  ;;  %v914_v40 = vsel %vm912_vm4, %v905_v25, %v783_v1 }
  0xf2   : > { %v789_v10 = vpop.permute.xlu1 %788  ;;  %v787_v61 = vpop.permute.xlu0 %786 }
  0xf3   : > { %v920_v47 = vsel %vm912_vm4, %v911_v41, %v789_v10  ;;  %v918_v48 = vsel %vm912_vm4, %v909_v42, %v787_v61 }
  0xf6   : > { %v833_v11 = vpop.permute.xlu1 %832  ;;  %v831_v12 = vpop.permute.xlu0 %830 }
  0xf7   : > { %v925_v30 = vsel %vm921_vm5, %v916_v28, %v833_v11  ;;  %v923_v31 = vsel %vm921_vm5, %v914_v40, %v831_v12 }
  0xfa   : > { %v837_v13 = vpop.permute.xlu1 %836  ;;  %v835_v0 = vpop.permute.xlu0 %834 }
  0xfb   : > { %v929_v51 = vsel %vm921_vm5, %v920_v47, %v837_v13  ;;  %v927_v52 = vsel %vm921_vm5, %v918_v48, %v835_v0 }
  0xfe   : > { %v847_v14 = vpop.permute.xlu1 %846  ;;  %v845_v15 = vpop.permute.xlu0 %844 }
  0xff   : > { %v934_v35 = vsel %vm930_vm6, %v925_v30, %v847_v14  ;;  %v932_v39 = vsel %vm930_vm6, %v923_v31, %v845_v15 }
 0x102   : > { %v851_v16 = vpop.permute.xlu1 %850  ;;  %v849_v17 = vpop.permute.xlu0 %848 }
 0x103   : > { %v938_v54 = vsel %vm930_vm6, %v929_v51, %v851_v16  ;;  %v936_v55 = vsel %vm930_vm6, %v927_v52, %v849_v17 }
 0x106   : > { %v858_v18 = vpop.permute.xlu1 %857  ;;  %v856_v19 = vpop.permute.xlu0 %855 }
 0x107   : > { %v943_v46 = vsel %vm939_vm7, %v934_v35, %v858_v18  ;;  %v941_v44 = vsel %vm939_vm7, %v932_v39, %v856_v19 }
 0x10a   : > { %v862_v26 = vpop.permute.xlu1 %861  ;;  %v860_v27 = vpop.permute.xlu0 %859 }
 0x10b   : > { %v947_v56 = vsel %vm939_vm7, %v938_v54, %v862_v26  ;;  %v945_v57 = vsel %vm939_vm7, %v936_v55, %v860_v27 }
 0x10e   : > { %v876_v43 = vpop.permute.xlu1 %875  ;;  %v874_v45 = vpop.permute.xlu0 %873 }
 0x10f   : > { %v952_v49 = vsel %vm948_vm8, %v943_v46, %v876_v43  ;;  %v950_v50 = vsel %vm948_vm8, %v941_v44, %v874_v45 }
 0x110   : > { %v1358_v53 = vcombine.low %v950_v50, %v952_v49 }
 0x112   : > { %v880_v58 = vpop.permute.xlu1 %879  ;;  %1390 = vmatprep.mubr.msk.bf16.mxu0 %vm994_vm9, %v1358_v53  ;;  %v878_v59 = vpop.permute.xlu0 %877 }
 0x113   : > { %v956_v60 = vsel %vm948_vm8, %v947_v56, %v880_v58  ;;  %v954_v62 = vsel %vm948_vm8, %v945_v57, %v878_v59 }
 0x114   : > { %v1359_v34 = vcombine.low %v954_v62, %v956_v60 }
 0x116   : > { %1391 = vmatmul.mubr.msk.bf16.vlgmr.msra.gmra.mrb[0].mxu0 %vm994_vm9, %v1359_v34 }
 0x1e9   : > { %v1392_v37 = vpop.f32.mrb[0].mxu0 }
 0x1ea   : > { %v1048_v2 = vadd.f32 %v1392_v37, %v1357_v63  ;;  %v1039_v3 = vpop.f32.mrb[1].mxu0 }
 0x1eb   : > { %v1040_v4 = vadd.f32 %v1357_v63, %v1039_v3  ;;  %v1393_v5 = vpop.f32.mrb[2].mxu0 }
 0x1ec   : > { %1056 = vst [vmem:[%s622_s9 + $0x10] sm:$0xff] %v1048_v2  ;;  %v1051_v36 = vadd.f32 %v1393_v5, %v1357_v63  ;;  %v1042_v6 = vpop.f32.mrb[3].mxu0 }
 0x1ed   : > { %1054 = vst [vmem:[%s622_s9] sm:$0xff] %v1040_v4  ;;  %v1043_v7 = vadd.f32 %v1357_v63, %v1042_v6 }
 0x1ee   : > { %1057 = vst [vmem:[%s622_s9 + $0x18] sm:$0xff] %v1051_v36 }
 0x1ef   : > { %1055 = vst [vmem:[%s622_s9 + $0x8] sm:$0xff] %v1043_v7 }
 0x1f0   : > { %1598 = shalt.err (!%p1595_p0)
}
 0x1f1   : > { %s1599_s13 = scalar_lea.hbm %s2161_s6, 512  ;;  %s1603_s16 = scalar_lea.hbm %s2249_s12, 2048 }
 0x1f2   : > { %p1600_p1 = scmp.ne.s32.totalorder %s2161_s6, %s1599_s13  ;;  %p1604_p4 = scmp.lt.u32.totalorder %s2161_s6, %s2249_s12 }
 0x1f3   : > { %p1605_p5 = scmp.lt.u32.totalorder %s1603_s16, %s1599_s13  ;;  %p1607_p7 = scmp.lt.u32.totalorder %s1599_s13, %s2161_s6 }
 0x1f4   : > { %p1601_p2 = pnand %p1600_p1, %p1887_p11 }
 0x1f5   : > { %p1606_p6 = por %p1605_p5, %p1604_p4 }
 0x1f6   : > { %p1602_p3 = pneg %p1601_p2 }
 0x1f7   : > { %p1608_p8 = por %p1607_p7, %p1606_p6 }
 0x1f9   : > { %p1609_p9 = pnand %p1608_p8, %p1602_p3 }
 0x1fb   : > { %1612 = shalt.err (!%p1609_p9)
}
 0x1fc   : > { %s1759_s9 = smov 128  }
 0x1fd   : > { %1396 = dma.vmem_to_hbm [thread:$0]  (%p1887_p11), %s2156_s10, 512, %s2161_s6, %s1059_s29, %s1759_s9, %s1759_s9, %s1751_s19  }
 0x1fe PF: > { %p1402_p10 = scmp.ge.s32.totalorder %s1732_s24, 2  ;;  %s1090_s11 = sand.u32 1, %s1696_s15  }
 0x1ff   : > { %s1091_s20 = scalar_lea.sflag [#allocation5], %s1090_s11 }
 0x200   : > { %p1399_p12 = pnand %p1402_p10, %p1893_p13 }
 0x202   : > { %1687 = dma.done.wait (!%p1399_p12), %s1091_s20, 512  }
 0x203   : > { %1689 = vsyncadd (!%p1399_p12), %s1091_s20, 4294966784  ;;  %s17_s24 = sadd.s32 1, %s1732_s24   ;;  %s2250_s30 = sld [smem:[#allocation7_spill]] }
 0x204   : > { %p14_p0 = scmp.ge.s32.totalorder %s17_s24, 6   ;;  %s2251_s19 = sld [smem:[#allocation10_spill]] }
 0x205   : > { %s2252_s8 = sld [smem:[#allocation8_spill]]  ;;  %s2253_s10 = sld [smem:[#allocation9_spill]] }
 0x206   : > { %s2254_s15 = smov %s1708_s18  ;;  %s2255_s16 = smov %s1704_s17 }
 0x207   : > { %s2256_s17 = smov %s1876_s7  ;;  %s2258_s20 = smov %s1724_s22 }
 0x208   : > { %s2259_s21 = smov %s1728_s23  ;;  %16 = sbr.rel (!%p14_p0) target bundleno = 10 (0xa), region = 233 }
 0x209   : > { %s2257_s18 = smov %s2250_s30 }
 0x20b   : > { %s2260_s22 = smov %s2252_s8  ;;  %s2261_s23 = smov %s2253_s10 }
 0x20f   :  { %1096 = vsyncpa [#allocation5], 1 }
 0x210   :  { %1098 = vsyncpa [#allocation5 + $0x1], 1 }

</bundles_post_ra>
